<compile_context>
chip_gen: v5e
topology: v5e:2x2
jax: 0.10.0
libtpu: 0.0.40
codegen_flags: <defaults>
</compile_context>

<pallas_src>
import functools

import jax
import jax.numpy as jnp
import numpy as np
from jax import lax
from jax.experimental import pallas as pl
from jax.experimental.pallas import tpu as pltpu


def _ntxen_kernel(zrow_ref, zcol_ref, yrow_ref, ycol_ref, c_ref, d_ref,
                  m_sc, l_sc, w_cache, *, inf, tr, tc, sub, n_col, zcol_resident):
    i = pl.program_id(0)          # row tile of the [2N, 2N] plane
    j = pl.program_id(1)          # column tile
    n_grp = tr // sub

    def colsum(x):
        # [tr, tc] -> [sub, tc] sublane-aligned partial column sums (pure vreg adds
        # when sub == 8).  The sub -> 1 collapse happens once, in JAX, after the kernel.
        return jnp.sum(x.reshape(n_grp, sub, tc), axis=0)

    # ---- per-row-tile init: online-softmax state + this row tile's output blocks ----
    @pl.when(j == 0)
    def _init():
        m_sc[...] = jnp.full_like(m_sc, -jnp.inf)
        l_sc[...] = jnp.zeros_like(l_sc)
        c_ref[...] = jnp.zeros_like(c_ref)
        d_ref[...] = jnp.zeros_like(d_ref)

    # Diagonal mask via global indices; only tiles straddling the diagonal hit it.
    row_ids = i * tr + lax.broadcasted_iota(jnp.int32, (tr, tc), 0)
    col_ids = j * tc + lax.broadcasted_iota(jnp.int32, (tr, tc), 1)
    ondiag = row_ids == col_ids

    # ---- RBF label weights: augmented-label MXU matmul gives -gamma*||y_i - y_j||^2 ----
    w = jnp.exp(jnp.dot(yrow_ref[...], ycol_ref[...],
                        preferred_element_type=jnp.float32))
    w = jnp.where(ondiag, 0.0, w)           # zero the diagonal
    w_cache[j] = w.astype(w_cache.dtype)    # cache the row strip for the lse subtraction

    # ---- similarity tile on the MXU (1/temperature pre-folded into the row operand) ----
    zc = zcol_ref[j] if zcol_resident else zcol_ref[0]
    s = jnp.dot(zrow_ref[...], zc, preferred_element_type=jnp.float32)
    s = jnp.where(ondiag, s - inf, s)       # -INF (finite 1e8) on the global diagonal

    # ---- flash-style online softmax statistics for this row strip ----
    m_prev = m_sc[...]
    m_new = jnp.maximum(m_prev, jnp.max(s, axis=1, keepdims=True))
    l_sc[...] = (l_sc[...] * jnp.exp(m_prev - m_new)
                 + jnp.sum(jnp.exp(s - m_new), axis=1, keepdims=True))
    m_sc[...] = m_new

    # ---- column accumulators: W-weighted logits and RBF column sums ----
    c_ref[j] += colsum(w * s)
    d_ref[j] += colsum(w)

    # ---- last column tile of this row strip: lse is final, subtract W * lse for every
    #      column tile using the bf16 cache (no RBF recompute, no second grid sweep) ----
    @pl.when(j == n_col - 1)
    def _subtract_lse():
        lse = m_sc[...] + jnp.log(l_sc[...])          # [tr, 1] = m_i + log(l_i)

        def body(jj, carry):
            wt = w_cache[jj].astype(jnp.float32) * lse
            c_ref[jj] -= colsum(wt)
            return carry

        lax.fori_loop(0, n_col, body, 0)


def _pick_tile(m, target, quantum):
    """Largest multiple of `quantum` <= target that divides m; else the full m."""
    t = min(target, m)
    t -= t % quantum
    while t >= quantum:
        if m % t == 0:
            return t
        t -= quantum
    return m   # full extent is always a legal BlockSpec dim (see TODO about padding)


def _padded_bytes(rows, cols, itemsize, sub_q):
    rp = ((rows + sub_q - 1) // sub_q) * sub_q
    cp = ((cols + 127) // 128) * 128
    return rp * cp * itemsize


def generalized_supervised_ntxent_loss(z_i, z_j, labels, temperature=0.1, sigma=1.0,
                                       row_tile=256, col_tile=512, use_bf16=True,
                                       zcol_resident_max_bytes=8 * 1024 * 1024,
                                       vmem_cap_bytes=48 * 1024 * 1024):
    n, d = z_i.shape
    m = 2 * n
    lab = labels.reshape(n, -1).astype(jnp.float32)
    num_labels = lab.shape[1]
    gamma = 1.0 / (2.0 * float(sigma) ** 2)
    inv_temp = 1.0 / float(temperature)

    # --- cheap O(M*D) prep in plain JAX: L2-normalize, fold 1/temperature into rows ---
    z = jnp.concatenate([z_i, z_j], axis=0).astype(jnp.float32)            # [M, D]
    inv_norm = lax.rsqrt(jnp.maximum(jnp.sum(z * z, axis=-1, keepdims=True), 1e-24))
    zn = z * inv_norm                                                      # == F.normalize
    mm_dtype = jnp.bfloat16 if use_bf16 else jnp.float32
    z_rows = (zn * inv_temp).astype(mm_dtype)                              # [M, D]

    tr = _pick_tile(m, row_tile, 16)    # bf16-friendly sublane quantum
    tc = _pick_tile(m, col_tile, 128)   # lane quantum
    n_row, n_col = m // tr, m // tc
    sub = 8 if tr % 8 == 0 else 1       # sublane-aligned partial-sum depth

    # Column operand laid out as [n_col, D, tc] so the kernel only indexes the leading
    # axis (no dynamic lane-offset slicing).
    z_cols = jnp.transpose(zn.astype(mm_dtype)).reshape(d, n_col, tc)
    z_cols = jnp.transpose(z_cols, (1, 0, 2))                              # [n_col, D, tc]

    # Augmented labels so the RBF exponent is a single tiny MXU matmul:
    #   rows_i = [y_i, |y_i|^2, 1, 0...],  cols_j = -gamma * [-2 y_j, 1, |y_j|^2, 0...]
    #   rows @ cols = -gamma * ||y_i - y_j||^2
    y = jnp.concatenate([lab, lab], axis=0)                                # [M, L]
    y2 = jnp.sum(y * y, axis=-1, keepdims=True)                            # [M, 1]
    ones = jnp.ones((m, 1), jnp.float32)
    k_log = num_labels + 2
    k_pad = ((k_log + 7) // 8) * 8
    zero_pad = jnp.zeros((m, k_pad - k_log), jnp.float32)
    y_rows = jnp.concatenate([y, y2, ones, zero_pad], axis=1)              # [M, K]
    y_cols = (-gamma) * jnp.concatenate([-2.0 * y, ones, y2, zero_pad], axis=1).T  # [K, M]

    zbytes = 2 if use_bf16 else 4
    zcol_resident = (z_cols.size * zbytes) <= zcol_resident_max_bytes

    if zcol_resident:
        zcol_spec = pl.BlockSpec((n_col, d, tc), lambda i, j: (0, 0, 0))   # fully resident
    else:
        zcol_spec = pl.BlockSpec((1, d, tc), lambda i, j: (j, 0, 0))       # streamed per col

    in_specs = [
        pl.BlockSpec((tr, d), lambda i, j: (i, 0)),        # Z rows (resident across j)
        zcol_spec,                                         # Z^T columns
        pl.BlockSpec((tr, k_pad), lambda i, j: (i, 0)),    # augmented labels, rows
        pl.BlockSpec((k_pad, tc), lambda i, j: (0, j)),    # augmented labels, cols (tiny)
    ]
    out_shape = (jax.ShapeDtypeStruct((n_row * n_col, sub, tc), jnp.float32),
                 jax.ShapeDtypeStruct((n_row * n_col, sub, tc), jnp.float32))
    out_specs = (pl.BlockSpec((n_col, sub, tc), lambda i, j: (i, 0, 0)),   # per-row-tile C
                 pl.BlockSpec((n_col, sub, tc), lambda i, j: (i, 0, 0)))   # per-row-tile D
    scratch_shapes = [
        pltpu.VMEM((tr, 1), jnp.float32),                  # running row max
        pltpu.VMEM((tr, 1), jnp.float32),                  # running sum of exp
        pltpu.VMEM((n_col, tr, tc), jnp.bfloat16),         # cached W row strip
    ]

    # --- VMEM budget: actual footprint + headroom, capped for v7x (raise cap on v5e/v6e) ---
    z_sub_q = 16 if use_bf16 else 8
    est = 0
    est += 2 * _padded_bytes(tr, d, zbytes, z_sub_q)                       # Z rows
    if zcol_resident:
        est += 2 * n_col * _padded_bytes(d, tc, zbytes, z_sub_q)           # Z^T resident
    else:
        est += 2 * _padded_bytes(d, tc, zbytes, z_sub_q)                   # Z^T streamed
    est += 2 * _padded_bytes(tr, k_pad, 4, 8)                              # label rows
    est += 2 * _padded_bytes(k_pad, tc, 4, 8)                              # label cols
    est += 2 * 2 * n_col * _padded_bytes(sub, tc, 4, 8)                    # C and D outputs
    est += n_col * _padded_bytes(tr, tc, 2, 16)                            # W cache
    est += 6 * _padded_bytes(tr, tc, 4, 8)                                 # live intermediates
    est = int(est * 1.25) + (2 << 20)
    vmem_limit = int(min(max(est, 32 << 20), vmem_cap_bytes))

    kernel = functools.partial(
        _ntxen_kernel, inf=1e8, tr=tr, tc=tc, sub=sub, n_col=n_col,
        zcol_resident=zcol_resident)

    c_part, d_part = pl.pallas_call(
        kernel,
        out_shape=out_shape,
        grid_spec=pltpu.PrefetchScalarGridSpec(
            num_scalar_prefetch=0,
            grid=(n_row, n_col),
            in_specs=in_specs,
            out_specs=out_specs,
            scratch_shapes=scratch_shapes),
        compiler_params=pltpu.CompilerParams(
            # Row tiles are independent (per-row-tile C/D outputs) -> megacore on v7x.
            dimension_semantics=("parallel", "arbitrary"),
            vmem_limit_bytes=vmem_limit),
    )(z_rows, z_cols, y_rows, y_cols)

    # Final tiny reduction in plain JAX:
    #   loss = -1/N * sum_j C_j / D_j   (W symmetric => colsum == rowsum, matching the
    #   numpy `weights /= weights.sum(axis=1)` broadcasting in the reference).
    c_cols = jnp.sum(c_part.reshape(n_row, n_col, sub, tc), axis=(0, 2))   # [n_col, tc]
    d_cols = jnp.sum(d_part.reshape(n_row, n_col, sub, tc), axis=(0, 2))
    # NOTE: like the reference, this is inf/nan if an entire column's RBF weights underflow.
    return -(1.0 / float(n)) * jnp.sum(c_cols / d_cols)


def _reference_loss(z_i, z_j, labels, temperature=0.1, sigma=1.0):
    """Pure numpy (float64) re-implementation of the PyTorch forward."""
    z_i = np.asarray(z_i, np.float64)
    z_j = np.asarray(z_j, np.float64)
    labels = np.asarray(labels, np.float64)
    n = z_i.shape[0]
    inf = 1e8

    def normalize(x):
        nrm = np.sqrt((x * x).sum(-1, keepdims=True))
        return x / np.maximum(nrm, 1e-12)

    zi, zj = normalize(z_i), normalize(z_j)
    sim_zii = zi @ zi.T / temperature - inf * np.eye(n)
    sim_zjj = zj @ zj.T / temperature - inf * np.eye(n)
    sim_zij = zi @ zj.T / temperature
    all_labels = np.concatenate([labels.reshape(n, -1)] * 2, axis=0)
    d2 = ((all_labels[:, None, :] - all_labels[None, :, :]) ** 2).sum(-1)
    gamma = 1.0 / (2 * sigma ** 2)
    weights = np.exp(-gamma * d2)
    weights = weights * (1 - np.eye(2 * n))
    weights = weights / weights.sum(axis=1)
    sim_z = np.block([[sim_zii, sim_zij], [sim_zij.T, sim_zjj]])
    mx = sim_z.max(axis=1, keepdims=True)
    log_sm = sim_z - mx - np.log(np.exp(sim_z - mx).sum(axis=1, keepdims=True))
    return -1.0 / n * (weights * log_sm).sum()


if __name__ == "__main__":
    key = jax.random.PRNGKey(0)
    k1, k2, k3 = jax.random.split(key, 3)
    N, D, L = 128, 32, 3
    z_i = jax.random.normal(k1, (N, D), dtype=jnp.float32)
    z_j = jax.random.normal(k2, (N, D), dtype=jnp.float32)
    labels = jax.random.normal(k3, (N, L), dtype=jnp.float32)

    # Small tiles so the 2N=256 plane exercises the full (row, col) grid:
    # grid = (4, 2) with multi-tile online softmax, the W cache, the in-kernel
    # lse-subtraction loop, and the per-row-tile C/D partial outputs.
    loss = generalized_supervised_ntxent_loss(z_i, z_j, labels,
                                              temperature=0.1, sigma=1.0,
                                              row_tile=64, col_tile=128)
    loss = jax.block_until_ready(loss)

    ref = _reference_loss(np.array(z_i), np.array(z_j), np.array(labels),
                          temperature=0.1, sigma=1.0)
    np.testing.assert_allclose(float(loss), float(ref), rtol=3e-2, atol=1e-2)
    print("KERNEL_OK")
</pallas_src>

<mosaic_0001>
module attributes {stable_mosaic.version = 11 : i64} {
  func.func @_ntxen_kernel(%arg0: i32, %arg1: i32, %arg2: memref<64x32xbf16, #tpu.memory_space<vmem>>, %arg3: memref<2x32x128xbf16, #tpu.memory_space<vmem>>, %arg4: memref<64x8xf32, #tpu.memory_space<vmem>>, %arg5: memref<8x128xf32, #tpu.memory_space<vmem>>, %arg6: memref<2x8x128xf32, #tpu.memory_space<vmem>>, %arg7: memref<2x8x128xf32, #tpu.memory_space<vmem>>, %arg8: memref<64x1xf32, #tpu.memory_space<vmem>>, %arg9: memref<64x1xf32, #tpu.memory_space<vmem>>, %arg10: memref<2x64x128xbf16, #tpu.memory_space<vmem>>) attributes {dimension_semantics = [#tpu.dimension_semantics<parallel>, #tpu.dimension_semantics<arbitrary>], iteration_bounds = array<i64: 4, 2>, scalar_prefetch = 0 : i64, scratch_operands = 3 : i64, tpu.core_type = #tpu.core_type<tc>, window_params = [{transform_indices = @transform_0, window_bounds = array<i64: 64, 32>}, {pipeline_mode = #tpu.pipeline_mode<synchronous>, transform_indices = @transform_1, window_bounds = array<i64: 2, 32, 128>}, {transform_indices = @transform_2, window_bounds = array<i64: 64, 8>}, {transform_indices = @transform_3, window_bounds = array<i64: 8, 128>}, {transform_indices = @transform_4, window_bounds = array<i64: 2, 8, 128>}, {transform_indices = @transform_5, window_bounds = array<i64: 2, 8, 128>}]} {
    %c0_i32 = arith.constant 0 : i32
    %0 = arith.cmpi eq, %arg1, %c0_i32 : i32
    %1 = arith.extui %0 : i1 to i32
    %c0_i32_0 = arith.constant 0 : i32
    %2 = arith.cmpi ne, %1, %c0_i32_0 : i32
    scf.if %2 {
      %cst_34 = arith.constant 0xFF800000 : f32
      %71 = vector.broadcast %cst_34 : f32 to vector<64x1xf32>
      %c0_35 = arith.constant 0 : index
      %c0_36 = arith.constant 0 : index
      %72 = vector.load %arg8[%c0_35, %c0_36] : memref<64x1xf32, #tpu.memory_space<vmem>>, vector<64x1xf32>
      tpu.vector_store %arg8[%c0_35, %c0_36], %71 {strides = array<i32>} : memref<64x1xf32, #tpu.memory_space<vmem>>, vector<64x1xf32>,
      %cst_37 = arith.constant 0.000000e+00 : f32
      %73 = vector.broadcast %cst_37 : f32 to vector<64x1xf32>
      %c0_38 = arith.constant 0 : index
      %c0_39 = arith.constant 0 : index
      %74 = vector.load %arg9[%c0_38, %c0_39] : memref<64x1xf32, #tpu.memory_space<vmem>>, vector<64x1xf32>
      tpu.vector_store %arg9[%c0_38, %c0_39], %73 {strides = array<i32>} : memref<64x1xf32, #tpu.memory_space<vmem>>, vector<64x1xf32>,
      %cst_40 = arith.constant 0.000000e+00 : f32
      %75 = vector.broadcast %cst_40 : f32 to vector<2x8x128xf32>
      %c0_41 = arith.constant 0 : index
      %c0_42 = arith.constant 0 : index
      %c0_43 = arith.constant 0 : index
      %76 = vector.load %arg6[%c0_41, %c0_42, %c0_43] : memref<2x8x128xf32, #tpu.memory_space<vmem>>, vector<2x8x128xf32>
      tpu.vector_store %arg6[%c0_41, %c0_42, %c0_43], %75 {strides = array<i32>} : memref<2x8x128xf32, #tpu.memory_space<vmem>>, vector<2x8x128xf32>,
      %cst_44 = arith.constant 0.000000e+00 : f32
      %77 = vector.broadcast %cst_44 : f32 to vector<2x8x128xf32>
      %c0_45 = arith.constant 0 : index
      %c0_46 = arith.constant 0 : index
      %c0_47 = arith.constant 0 : index
      %78 = vector.load %arg7[%c0_45, %c0_46, %c0_47] : memref<2x8x128xf32, #tpu.memory_space<vmem>>, vector<2x8x128xf32>
      tpu.vector_store %arg7[%c0_45, %c0_46, %c0_47], %77 {strides = array<i32>} : memref<2x8x128xf32, #tpu.memory_space<vmem>>, vector<2x8x128xf32>,
    } else {
    }
    %c64_i32 = arith.constant 64 : i32
    %3 = arith.muli %arg0, %c64_i32 : i32
    %4 = tpu.iota {dimensions = array<i32: 0>} : vector<64x128xi32>
    %5 = vector.broadcast %3 : i32 to vector<64x128xi32>
    %6 = arith.addi %5, %4 : vector<64x128xi32>
    %c128_i32 = arith.constant 128 : i32
    %7 = arith.muli %arg1, %c128_i32 : i32
    %8 = tpu.iota {dimensions = array<i32: 1>} : vector<64x128xi32>
    %9 = vector.broadcast %7 : i32 to vector<64x128xi32>
    %10 = arith.addi %9, %8 : vector<64x128xi32>
    %11 = arith.cmpi eq, %6, %10 : vector<64x128xi32>
    %c0 = arith.constant 0 : index
    %c0_1 = arith.constant 0 : index
    %12 = vector.load %arg4[%c0, %c0_1] : memref<64x8xf32, #tpu.memory_space<vmem>>, vector<64x8xf32>
    %c0_2 = arith.constant 0 : index
    %c0_3 = arith.constant 0 : index
    %13 = vector.load %arg5[%c0_2, %c0_3] : memref<8x128xf32, #tpu.memory_space<vmem>>, vector<8x128xf32>
    %cst = arith.constant dense<0.000000e+00> : vector<64x128xf32>
    %14 = tpu.matmul %12, %13, %cst {dimension_numbers = #tpu.dot_dimension_numbers<[1], [0], [0], [1], [0, 0, 1, 1], [], []>} : vector<64x8xf32>, vector<8x128xf32>, vector<64x128xf32> -> vector<64x128xf32>
    %15 = math.exp %14 : vector<64x128xf32>
    %cst_4 = arith.constant 0.000000e+00 : f32
    %16 = vector.broadcast %cst_4 : f32 to vector<64x128xf32>
    %17 = arith.select %11, %16, %15 : vector<64x128xi1>, vector<64x128xf32>
    %18 = arith.truncf %17 : vector<64x128xf32> to vector<64x128xbf16>
    %19 = arith.index_cast %arg1 : i32 to index
    %c0_5 = arith.constant 0 : index
    %c0_6 = arith.constant 0 : index
    %20 = vector.load %arg10[%19, %c0_5, %c0_6] : memref<2x64x128xbf16, #tpu.memory_space<vmem>>, vector<1x64x128xbf16>
    %21 = vector.shape_cast %20 : vector<1x64x128xbf16> to vector<64x128xbf16>
    %22 = vector.shape_cast %18 : vector<64x128xbf16> to vector<1x64x128xbf16>
    tpu.vector_store %arg10[%19, %c0_5, %c0_6], %22 {strides = array<i32>} : memref<2x64x128xbf16, #tpu.memory_space<vmem>>, vector<1x64x128xbf16>,
    %23 = arith.index_cast %arg1 : i32 to index
    %c0_7 = arith.constant 0 : index
    %c0_8 = arith.constant 0 : index
    %24 = vector.load %arg3[%23, %c0_7, %c0_8] : memref<2x32x128xbf16, #tpu.memory_space<vmem>>, vector<1x32x128xbf16>
    %25 = vector.shape_cast %24 : vector<1x32x128xbf16> to vector<32x128xbf16>
    %c0_9 = arith.constant 0 : index
    %c0_10 = arith.constant 0 : index
    %26 = vector.load %arg2[%c0_9, %c0_10] : memref<64x32xbf16, #tpu.memory_space<vmem>>, vector<64x32xbf16>
    %cst_11 = arith.constant dense<0.000000e+00> : vector<64x128xf32>
    %27 = tpu.matmul %26, %25, %cst_11 {dimension_numbers = #tpu.dot_dimension_numbers<[1], [0], [0], [1], [0, 0, 1, 1], [], []>} : vector<64x32xbf16>, vector<32x128xbf16>, vector<64x128xf32> -> vector<64x128xf32>
    %cst_12 = arith.constant 1.000000e+08 : f32
    %28 = vector.broadcast %cst_12 : f32 to vector<64x128xf32>
    %29 = arith.subf %27, %28 : vector<64x128xf32>
    %30 = arith.select %11, %29, %27 : vector<64x128xi1>, vector<64x128xf32>
    %c0_13 = arith.constant 0 : index
    %c0_14 = arith.constant 0 : index
    %31 = vector.load %arg8[%c0_13, %c0_14] : memref<64x1xf32, #tpu.memory_space<vmem>>, vector<64x1xf32>
    %cst_15 = arith.constant dense<0xFF800000> : vector<64xf32>
    %32 = vector.multi_reduction <maximumf>, %30, %cst_15 [1] : vector<64x128xf32> to vector<64xf32>
    %33 = vector.shape_cast %32 : vector<64xf32> to vector<64x1xf32>
    %34 = arith.maximumf %31, %33 : vector<64x1xf32>
    %c0_16 = arith.constant 0 : index
    %c0_17 = arith.constant 0 : index
    %35 = vector.load %arg9[%c0_16, %c0_17] : memref<64x1xf32, #tpu.memory_space<vmem>>, vector<64x1xf32>
    %36 = arith.subf %31, %34 : vector<64x1xf32>
    %37 = math.exp %36 : vector<64x1xf32>
    %38 = arith.mulf %35, %37 : vector<64x1xf32>
    %39 = vector.broadcast %34 : vector<64x1xf32> to vector<64x128xf32>
    %40 = arith.subf %30, %39 : vector<64x128xf32>
    %41 = math.exp %40 : vector<64x128xf32>
    %cst_18 = arith.constant dense<0.000000e+00> : vector<64xf32>
    %42 = vector.multi_reduction <add>, %41, %cst_18 [1] : vector<64x128xf32> to vector<64xf32>
    %43 = vector.shape_cast %42 : vector<64xf32> to vector<64x1xf32>
    %44 = arith.addf %38, %43 : vector<64x1xf32>
    %c0_19 = arith.constant 0 : index
    %c0_20 = arith.constant 0 : index
    %45 = vector.load %arg9[%c0_19, %c0_20] : memref<64x1xf32, #tpu.memory_space<vmem>>, vector<64x1xf32>
    tpu.vector_store %arg9[%c0_19, %c0_20], %44 {strides = array<i32>} : memref<64x1xf32, #tpu.memory_space<vmem>>, vector<64x1xf32>,
    %c0_21 = arith.constant 0 : index
    %c0_22 = arith.constant 0 : index
    %46 = vector.load %arg8[%c0_21, %c0_22] : memref<64x1xf32, #tpu.memory_space<vmem>>, vector<64x1xf32>
    tpu.vector_store %arg8[%c0_21, %c0_22], %34 {strides = array<i32>} : memref<64x1xf32, #tpu.memory_space<vmem>>, vector<64x1xf32>,
    %47 = arith.index_cast %arg1 : i32 to index
    %c0_23 = arith.constant 0 : index
    %c0_24 = arith.constant 0 : index
    %48 = vector.load %arg6[%47, %c0_23, %c0_24] : memref<2x8x128xf32, #tpu.memory_space<vmem>>, vector<1x8x128xf32>
    %49 = vector.shape_cast %48 : vector<1x8x128xf32> to vector<8x128xf32>
    %50 = arith.mulf %17, %30 : vector<64x128xf32>
    %51 = vector.shape_cast %50 : vector<64x128xf32> to vector<8x8x128xf32>
    %cst_25 = arith.constant dense<0.000000e+00> : vector<8x128xf32>
    %52 = vector.multi_reduction <add>, %51, %cst_25 [0] : vector<8x8x128xf32> to vector<8x128xf32>
    %53 = arith.addf %49, %52 : vector<8x128xf32>
    %54 = arith.index_cast %arg1 : i32 to index
    %c0_26 = arith.constant 0 : index
    %c0_27 = arith.constant 0 : index
    %55 = vector.load %arg6[%54, %c0_26, %c0_27] : memref<2x8x128xf32, #tpu.memory_space<vmem>>, vector<1x8x128xf32>
    %56 = vector.shape_cast %55 : vector<1x8x128xf32> to vector<8x128xf32>
    %57 = vector.shape_cast %53 : vector<8x128xf32> to vector<1x8x128xf32>
    tpu.vector_store %arg6[%54, %c0_26, %c0_27], %57 {strides = array<i32>} : memref<2x8x128xf32, #tpu.memory_space<vmem>>, vector<1x8x128xf32>,
    %58 = arith.index_cast %arg1 : i32 to index
    %c0_28 = arith.constant 0 : index
    %c0_29 = arith.constant 0 : index
    %59 = vector.load %arg7[%58, %c0_28, %c0_29] : memref<2x8x128xf32, #tpu.memory_space<vmem>>, vector<1x8x128xf32>
    %60 = vector.shape_cast %59 : vector<1x8x128xf32> to vector<8x128xf32>
    %61 = vector.shape_cast %17 : vector<64x128xf32> to vector<8x8x128xf32>
    %cst_30 = arith.constant dense<0.000000e+00> : vector<8x128xf32>
    %62 = vector.multi_reduction <add>, %61, %cst_30 [0] : vector<8x8x128xf32> to vector<8x128xf32>
    %63 = arith.addf %60, %62 : vector<8x128xf32>
    %64 = arith.index_cast %arg1 : i32 to index
    %c0_31 = arith.constant 0 : index
    %c0_32 = arith.constant 0 : index
    %65 = vector.load %arg7[%64, %c0_31, %c0_32] : memref<2x8x128xf32, #tpu.memory_space<vmem>>, vector<1x8x128xf32>
    %66 = vector.shape_cast %65 : vector<1x8x128xf32> to vector<8x128xf32>
    %67 = vector.shape_cast %63 : vector<8x128xf32> to vector<1x8x128xf32>
    tpu.vector_store %arg7[%64, %c0_31, %c0_32], %67 {strides = array<i32>} : memref<2x8x128xf32, #tpu.memory_space<vmem>>, vector<1x8x128xf32>,
    %c1_i32 = arith.constant 1 : i32
    %68 = arith.cmpi eq, %arg1, %c1_i32 : i32
    %69 = arith.extui %68 : i1 to i32
    %c0_i32_33 = arith.constant 0 : i32
    %70 = arith.cmpi ne, %69, %c0_i32_33 : i32
    scf.if %70 {
      %c0_34 = arith.constant 0 : index
      %c0_35 = arith.constant 0 : index
      %71 = vector.load %arg8[%c0_34, %c0_35] : memref<64x1xf32, #tpu.memory_space<vmem>>, vector<64x1xf32>
      %c0_36 = arith.constant 0 : index
      %c0_37 = arith.constant 0 : index
      %72 = vector.load %arg9[%c0_36, %c0_37] : memref<64x1xf32, #tpu.memory_space<vmem>>, vector<64x1xf32>
      %73 = math.log %72 : vector<64x1xf32>
      %74 = arith.addf %71, %73 : vector<64x1xf32>
      %c0_i32_38 = arith.constant 0 : i32
      %c2_i32 = arith.constant 2 : i32
      %75 = arith.addi %c0_i32_38, %c2_i32 : i32
      %c1_i32_39 = arith.constant 1 : i32
      scf.for %arg11 = %c0_i32_38 to %75 step %c1_i32_39  : i32 {
        %76 = arith.index_cast %arg11 : i32 to index
        %c0_41 = arith.constant 0 : index
        %c0_42 = arith.constant 0 : index
        %77 = vector.load %arg10[%76, %c0_41, %c0_42] : memref<2x64x128xbf16, #tpu.memory_space<vmem>>, vector<1x64x128xbf16>
        %78 = vector.shape_cast %77 : vector<1x64x128xbf16> to vector<64x128xbf16>
        %79 = arith.extf %78 : vector<64x128xbf16> to vector<64x128xf32>
        %80 = vector.broadcast %74 : vector<64x1xf32> to vector<64x128xf32>
        %81 = arith.mulf %79, %80 : vector<64x128xf32>
        %82 = arith.index_cast %arg11 : i32 to index
        %c0_43 = arith.constant 0 : index
        %c0_44 = arith.constant 0 : index
        %83 = vector.load %arg6[%82, %c0_43, %c0_44] : memref<2x8x128xf32, #tpu.memory_space<vmem>>, vector<1x8x128xf32>
        %84 = vector.shape_cast %83 : vector<1x8x128xf32> to vector<8x128xf32>
        %85 = vector.shape_cast %81 : vector<64x128xf32> to vector<8x8x128xf32>
        %cst_45 = arith.constant dense<0.000000e+00> : vector<8x128xf32>
        %86 = vector.multi_reduction <add>, %85, %cst_45 [0] : vector<8x8x128xf32> to vector<8x128xf32>
        %87 = arith.subf %84, %86 : vector<8x128xf32>
        %88 = arith.index_cast %arg11 : i32 to index
        %c0_46 = arith.constant 0 : index
        %c0_47 = arith.constant 0 : index
        %89 = vector.load %arg6[%88, %c0_46, %c0_47] : memref<2x8x128xf32, #tpu.memory_space<vmem>>, vector<1x8x128xf32>
        %90 = vector.shape_cast %89 : vector<1x8x128xf32> to vector<8x128xf32>
        %91 = vector.shape_cast %87 : vector<8x128xf32> to vector<1x8x128xf32>
        tpu.vector_store %arg6[%88, %c0_46, %c0_47], %91 {strides = array<i32>} : memref<2x8x128xf32, #tpu.memory_space<vmem>>, vector<1x8x128xf32>,
      }
      %c2_i32_40 = arith.constant 2 : i32
    } else {
    }
    return
  }
  func.func @transform_0(%arg0: i32, %arg1: i32) -> (i32, i32) {
    %c0_i32 = arith.constant 0 : i32
    %c0_i32_0 = arith.constant 0 : i32
    return %arg0, %c0_i32 : i32, i32
  }
  func.func @transform_1(%arg0: i32, %arg1: i32) -> (i32, i32, i32) {
    %c0_i32 = arith.constant 0 : i32
    %c0_i32_0 = arith.constant 0 : i32
    %c0_i32_1 = arith.constant 0 : i32
    %c0_i32_2 = arith.constant 0 : i32
    return %c0_i32, %c0_i32_0, %c0_i32_1 : i32, i32, i32
  }
  func.func @transform_2(%arg0: i32, %arg1: i32) -> (i32, i32) {
    %c0_i32 = arith.constant 0 : i32
    %c0_i32_0 = arith.constant 0 : i32
    return %arg0, %c0_i32 : i32, i32
  }
  func.func @transform_3(%arg0: i32, %arg1: i32) -> (i32, i32) {
    %c0_i32 = arith.constant 0 : i32
    %c0_i32_0 = arith.constant 0 : i32
    return %c0_i32, %arg1 : i32, i32
  }
  func.func @transform_4(%arg0: i32, %arg1: i32) -> (i32, i32, i32) {
    %c0_i32 = arith.constant 0 : i32
    %c0_i32_0 = arith.constant 0 : i32
    %c0_i32_1 = arith.constant 0 : i32
    return %arg0, %c0_i32, %c0_i32_0 : i32, i32, i32
  }
  func.func @transform_5(%arg0: i32, %arg1: i32) -> (i32, i32, i32) {
    %c0_i32 = arith.constant 0 : i32
    %c0_i32_0 = arith.constant 0 : i32
    %c0_i32_1 = arith.constant 0 : i32
    return %arg0, %c0_i32, %c0_i32_0 : i32, i32, i32
  }
}

</mosaic_0001>

<bundles_post_ra>
// kernel: tpu_custom_call.1
= control target key start
LH: loop header
LB: loop body
LE: loop exit
PB: predicated region body
PF: predicated region fallthrough
CT: control target
= control target key end

     0   :  { %11 = vsyncpa [#allocation6], 0  ;;  %s2016_s0 = inlined_call_operand.vmem [shape: bf16[256,32], index: 0, kind: input, shape index: {}]   ;;  %s2017_s1 = inlined_call_operand.vmem [shape: bf16[2,32,128], index: 1, kind: input, shape index: {}]   ;;  %s2018_s2 = inlined_call_operand.vmem [shape: f32[256,8], index: 2, kind: input, shape index: {}]   ;;  %s2019_s3 = inlined_call_operand.vmem [shape: f32[8,256], index: 3, kind: input, shape index: {}]   ;;  %s2020_s4 = inlined_call_operand.hbm [shape: f32[8,8,128], index: 4, kind: output, shape index: {0}]   ;;  %s2021_s5 = inlined_call_operand.hbm [shape: f32[8,8,128], index: 5, kind: output, shape index: {1}]  }
   0x1   :  { %13 = vsyncpa [#allocation6 + $0x1], 0 }
   0x2   :  { %14 = vsyncpa [#allocation8], 0 }
   0x3   :  { %16 = vsyncpa [#allocation8 + $0x1], 0  ;;  %s1552_s18 = smov 0   ;;  %s1554_s19 = smov 0  }
   0x4   :  { %s1556_s20 = smov 0   ;;  %s1558_s21 = smov 0  }
   0x5   :  { %s1560_s22 = smov 0   ;;  %s1562_s23 = smov 0  }
   0x6   :  { %s1564_s24 = smov 0   ;;  %s1566_s25 = smov 0  }
   0x7 LB: > { %2026 = sst [smem:[#allocation11_spill]] %s1490_s20  ;;  %s1090_s26 = sadd.s32 4294967295, %s1510_s25   ;;  %s1510_s25 = sphi %s1566_s25, %s22_s25   ;;  %s1506_s24 = sphi %s1564_s24, %s2039_s24   ;;  %s1502_s23 = sphi %s1562_s23, %s2038_s23   ;;  %s1498_s22 = sphi %s1560_s22, %s2037_s22   ;;  %s1494_s21 = sphi %s1558_s21, %s2036_s21   ;;  %s1490_s20 = sphi %s1556_s20, %s2035_s20   ;;  %s1486_s19 = sphi %s1554_s19, %s2041_s19   ;;  %s1482_s18 = sphi %s1552_s18, %s2040_s18  }
   0x8   : > { %2027 = sst [smem:[#allocation12_spill]] %s1502_s23  ;;  %s1091_s27 = sadd.s32 4294967294, %s1510_s25  }
   0x9   : > { %2028 = sst [smem:[#allocation13_spill]] %s1506_s24  ;;  %s31_s28 = sadd.s32 1, %s1502_s23 }
   0xa   : > { %p32_p0 = scmp.ge.s32.totalorder %s31_s28, 2  ;;  %s34_s29 = sadd.s32 1, %s1506_s24 }
   0xb   : > { %p150_p1 = scmp.ne.s32.totalorder %s1490_s20, %s1486_s19  ;;  %p151_p2 = scmp.eq.s32.totalorder %s1090_s26, 7 }
   0xc   : > { %s2043_s28 = smov (%p32_p0, %s31_s28), 0  ;;  %s2045_s29 = smov (!%p32_p0, %s34_s29), %s1506_s24 }
   0xd   : > { %2029 = sst [smem:[#allocation14_spill]] %s2043_s28  ;;  %p1601_p3 = por %p151_p2, %p150_p1 }
   0xe   : > { %p156_p4 = scmp.ne.s32.totalorder %s1486_s19, %s1482_s18  ;;  %p36_p5 = scmp.ge.s32.totalorder %s2045_s29, 4 }
   0xf   : > { %p157_p6 = scmp.eq.s32.totalorder %s1091_s27, 7  ;;  %p1094_p7 = scmp.ge.s32.totalorder %s1510_s25, 1 }
  0x10   : > { %p229_p8 = scmp.lt.s32.totalorder %s1510_s25, 9  ;;  %s2047_s29 = smov (%p36_p5, %s2045_s29), 0 }
  0x11   : > { %2031 = sst [smem:[#allocation15_spill]] %s2047_s29  ;;  %p1611_p9 = por %p157_p6, %p156_p4 }
  0x12   : > { %p230_p10 = pnand %p1094_p7, %p229_p8  ;;  %s137_s7 = ssub.s32 %s1506_s24, %s2047_s29 }
  0x13   : > { %s140_s8 = sadd.s32 1, %s1490_s20  ;;  %p138_p11 = scmp.eq.s32.totalorder %s137_s7, 0 }
  0x14   : > { %233 = sbr.rel (%p230_p10) target bundleno = 784 (0x310), region = 36  ;;  %s1622_s10 = sand.u32 (!%p230_p10), 1, %s1486_s19  }
  0x15   : > { %s1619_s9 = scalar_select %p138_p11, %s1490_s20, %s140_s8  }
  0x16   : > { %s1097_s11 = sshll.u32 (!%p230_p10), %s1498_s22, 3  ;;  %s1095_s12 = sshll.u32 (!%p230_p10), %s1622_s10, 4 }
  0x17   : > { %2033 = sst [smem:[#allocation16_spill]] %s1619_s9  ;;  %p272_p12 = scmp.lt.s32.totalorder (!%p230_p10), %s1097_s11, 31 }
  0x18   : > { %p283_p13 = scmp.lt.s32.totalorder (!%p230_p10), %s1494_s21, 1  ;;  %s1641_s9 = scalar_lea.vmem (!%p230_p10), [#allocation5], %s1095_s12 }
  0x19   : > { %s2049_s11 = smov (!%p272_p12, %s1097_s11), 31  ;;  %s1643_s20 = scalar_lea.vmem [#allocation7], %s1095_s12 }
  0x1a   : > { %s1098_s13 = sshll.u32 %s2049_s11, 2  ;;  %s1100_s14 = sshll.u32 %s2049_s11, 3 }
  0x1b   : > { %s1630_s17 = scalar_lea.vmem %s2016_s0, %s1098_s13  ;;  %s1635_s7 = scalar_lea.vmem %s2018_s2, %s1100_s14 }
  0x1c   : > { %s284_s8 = scalar_select %p283_p13, %s1494_s21, 1 }
  0x1d   : > { %p1102_p0 = scmp.ne.s32.totalorder %s1494_s21, 0 }
  0x1e   : > { %s1101_s29 = sshll.u32 %s284_s8, 3 }
  0x1f   : > { %s286_s23 = scalar_lea.vmem %s2019_s3, %s1101_s29  ;;  %293 = sbr.rel (%p1102_p0) target bundleno = 57 (0x39), region = 40 }
  0x24   : > { %vm294_vm0 = vcmask 7168   ;;  %v1516_v0 = vmov -inf   ;;  %v1517_v1 = vmov 0.0  }
  0x25   : > { %295 = vst.msk [vmem:[#allocation2] sm:$0xff] %vm294_vm0, %v1516_v0 }
  0x26   : > { %296 = vst.msk [vmem:[#allocation2 + $0x8] sm:$0xff] %vm294_vm0, %v1516_v0 }
  0x27   : > { %297 = vst.msk [vmem:[#allocation2 + $0x10] sm:$0xff] %vm294_vm0, %v1516_v0 }
  0x28   : > { %298 = vst.msk [vmem:[#allocation2 + $0x18] sm:$0xff] %vm294_vm0, %v1516_v0 }
  0x29   : > { %299 = vst.msk [vmem:[#allocation2 + $0x20] sm:$0xff] %vm294_vm0, %v1516_v0 }
  0x2a   : > { %300 = vst.msk [vmem:[#allocation2 + $0x28] sm:$0xff] %vm294_vm0, %v1516_v0 }
  0x2b   : > { %301 = vst.msk [vmem:[#allocation2 + $0x30] sm:$0xff] %vm294_vm0, %v1516_v0 }
  0x2c   : > { %302 = vst.msk [vmem:[#allocation2 + $0x38] sm:$0xff] %vm294_vm0, %v1516_v0 }
  0x2d   : > { %303 = vst.msk [vmem:[#allocation3] sm:$0xff] %vm294_vm0, %v1517_v1 }
  0x2e   : > { %304 = vst.msk [vmem:[#allocation3 + $0x8] sm:$0xff] %vm294_vm0, %v1517_v1 }
  0x2f   : > { %305 = vst.msk [vmem:[#allocation3 + $0x10] sm:$0xff] %vm294_vm0, %v1517_v1 }
  0x30   : > { %306 = vst.msk [vmem:[#allocation3 + $0x18] sm:$0xff] %vm294_vm0, %v1517_v1 }
  0x31   : > { %307 = vst.msk [vmem:[#allocation3 + $0x20] sm:$0xff] %vm294_vm0, %v1517_v1 }
  0x32   : > { %308 = vst.msk [vmem:[#allocation3 + $0x28] sm:$0xff] %vm294_vm0, %v1517_v1 }
  0x33   : > { %309 = vst.msk [vmem:[#allocation3 + $0x30] sm:$0xff] %vm294_vm0, %v1517_v1 }
  0x34   : > { %310 = vst.msk [vmem:[#allocation3 + $0x38] sm:$0xff] %vm294_vm0, %v1517_v1 }
  0x35   : > { %311 = vst [vmem:[%s1641_s9] sm:$0xff] %v1517_v1 }
  0x36   : > { %312 = vst [vmem:[%s1641_s9 + $0x8] sm:$0xff] %v1517_v1 }
  0x37   : > { %313 = vst [vmem:[%s1643_s20] sm:$0xff] %v1517_v1 }
  0x38   : > { %314 = vst [vmem:[%s1643_s20 + $0x8] sm:$0xff] %v1517_v1 }
  0x39 PF: > { %v355_v2 = vld [vmem:[%s286_s23] sm:$0xff]  ;;  %vm356_vm1 = vcmask 64512   ;;  %s1165_s24 = sshll.u32 %s1494_s21, 4  ;;  %v352_v4 = vld [vmem:[%s1635_s7 + $0x28] sm:$0xff]  ;;  %v1170_v9 = vld [vmem:[%s1630_s17 + $0x10] sm:$0xff]  ;;  %vm512_vm2 = vcmask 261120   ;;  %v316_v17 = vlaneseq }
  0x3a   : > { %v347_v3 = vld [vmem:[%s1635_s7] sm:$0xff]  ;;  %396 = vmatpush.msra.mxu0 %v355_v2  ;;  %s467_s11 = scalar_lea.vmem %s2017_s1, %s1165_s24  ;;  %1217 = vmatpush.msra.mxu3 %v355_v2  ;;  %v348_v7 = vld [vmem:[%s1635_s7 + $0x8] sm:$0xff]  ;;  %v353_v10 = vld [vmem:[%s1635_s7 + $0x30] sm:$0xff]  ;;  %s1103_s23 = sshll.u32 %s1498_s22, 6  ;;  %vm730_vm11 = vcmask 7168  }
  0x3b   : > { %1105 = vmatmul.msk.f32.vlgmr.msra.gmra.mxu0 %vm356_vm1, %v347_v3  ;;  %v1167_v5 = vld [vmem:[%s467_s11 + $0x8] sm:$0xff]  ;;  %1110 = vmatmul.msk.f32.vlgmr.msra.gmra.mxu3 %vm356_vm1, %v352_v4  ;;  %v1166_v6 = vld [vmem:[%s467_s11] sm:$0xff]  ;;  %v349_v11 = vld [vmem:[%s1635_s7 + $0x10] sm:$0xff]  ;;  %s1104_s12 = sshll.u32 %s1494_s21, 7  ;;  %v317_v19 = vshrl.u32 %v316_v17, 7  ;;  %v336_v20 = vand.u32 127, %v316_v17  ;;  %v1692_v21 = vstv %s1103_s23 }
  0x3c   : > { %531 = vmatpush.bf16.msra.mxu1 %v1167_v5  ;;  %1218 = vmatpush.bf16.msra.mxu2 %v1167_v5  ;;  %v1168_v8 = vld [vmem:[%s1630_s17] sm:$0xff]  ;;  %v354_v12 = vld [vmem:[%s1635_s7 + $0x38] sm:$0xff]  ;;  %v1169_v14 = vld [vmem:[%s1630_s17 + $0x8] sm:$0xff]  ;;  %v337_v22 = vstv %s1104_s12  ;;  %s1164_s13 = sshll.u32 %s1494_s21, 5  ;;  %s1113_s15 = sshll.u32 %s1494_s21, 3 }
  0x3d   : > { %v350_v13 = vld [vmem:[%s1635_s7 + $0x18] sm:$0xff]  ;;  %v351_v16 = vld [vmem:[%s1635_s7 + $0x20] sm:$0xff]  ;;  %v326_v24 = vadd.s32 %v1692_v21, %v317_v19  ;;  %v1695_v25 = vadd.s32 %v337_v22, %v336_v20  ;;  %v321_v27 = vadd.s32 32, %v317_v19  ;;  %v318_v28 = vadd.s32 8, %v317_v19  ;;  %s1735_s14 = scalar_lea.vmem [#allocation4], %s1164_s13  ;;  %s766_s16 = scalar_lea.vmem %s1643_s20, %s1113_s15 [#allocation7] }
  0x3e   : > { %v1171_v15 = vld [vmem:[%s1630_s17 + $0x18] sm:$0xff]  ;;  %v322_v39 = vadd.s32 40, %v317_v19  ;;  %v319_v42 = vadd.s32 16, %v317_v19  ;;  %v323_v55 = vadd.s32 48, %v317_v19  ;;  %v324_v56 = vadd.s32 56, %v317_v19  ;;  %s747_s17 = scalar_lea.vmem %s1641_s9, %s1113_s15 [#allocation5]  ;;  %p1153_p1 = scmp.ne.s32.totalorder %s1494_s21, 1 }
  0x3f   : > { %vm339_vm3 = vcmp.eq.s32.totalorder %v326_v24, %v1695_v25  ;;  %v1701_v33 = vadd.s32 %v1692_v21, %v321_v27  ;;  %v327_v34 = vadd.s32 %v1692_v21, %v318_v28  ;;  %v320_v60 = vadd.s32 24, %v317_v19  ;;  %s1939_s21 = smov (!%p1153_p1), 0  }
  0x40   : > { %532 = vmatpush.bf16.msra.mxu1 %v1166_v6  ;;  %1219 = vmatpush.bf16.msra.mxu2 %v1166_v6  ;;  %v1727_v51 = vadd.s32 %v1692_v21, %v322_v39  ;;  %v328_v54 = vadd.s32 %v1692_v21, %v319_v42  ;;  %v332_v1 = vadd.s32 %v1692_v21, %v323_v55 }
  0x41   : > { %vm343_vm4 = vcmp.eq.s32.totalorder %v1701_v33, %v1695_v25  ;;  %vm340_vm5 = vcmp.eq.s32.totalorder %v327_v34, %v1695_v25  ;;  %v333_v2 = vadd.s32 %v1692_v21, %v324_v56  ;;  %v329_v5 = vadd.s32 %v1692_v21, %v320_v60  ;;  %v767_v56 = vld [vmem:[%s766_s16] sm:$0xff] }
  0x42   : > { %vm344_vm6 = vcmp.eq.s32.totalorder %v1727_v51, %v1695_v25  ;;  %vm341_vm7 = vcmp.eq.s32.totalorder %v328_v54, %v1695_v25  ;;  %vm345_vm8 = vcmp.eq.s32.totalorder %v332_v1, %v1695_v25 }
  0x43   : > { %1106 = vmatmul.msk.f32.gmra.mxu0 %vm356_vm1, %v348_v7  ;;  %1111 = vmatmul.msk.f32.gmra.mxu3 %vm356_vm1, %v353_v10  ;;  %vm346_vm9 = vcmp.eq.s32.totalorder %v333_v2, %v1695_v25  ;;  %vm342_vm10 = vcmp.eq.s32.totalorder %v329_v5, %v1695_v25  ;;  %v1814_v5 = vld [vmem:[#allocation2 + $0x20] sm:$0xff] }
  0x44   : > { %1141 = vmatmul.msk.bf16.vlgmr.msra.gmra.mxu1 %vm512_vm2, %v1168_v8  ;;  %1143 = vmatmul.msk.bf16.vlgmr.msra.gmra.mxu2 %vm512_vm2, %v1170_v9 }
  0x4b   : > { %1107 = vmatmul.msk.f32.gmra.mxu0 %vm356_vm1, %v349_v11  ;;  %1112 = vmatmul.msk.f32.gmra.mxu3 %vm356_vm1, %v354_v12 }
  0x53   : > { %1108 = vmatmul.msk.f32.gmra.mxu0 %vm356_vm1, %v350_v13 }
  0x54   : > { %1142 = vmatmul.msk.bf16.gmra.mxu1 %vm512_vm2, %v1169_v14  ;;  %1144 = vmatmul.msk.bf16.gmra.mxu2 %vm512_vm2, %v1171_v15 }
  0x5b   : > { %1109 = vmatmul.msk.f32.gmra.mxu0 %vm356_vm1, %v351_v16 }
  0xb8   : > { %v398_v18 = vpop.f32.mrf.mxu0 }
  0xb9   : > { %v422_v23 = vmul.f32 1.442695, %v398_v18 }
  0xbb   : > { %1313 = vpow2.f32 %v422_v23 }
  0xbe   : > { %v1697_v26 = vpop.f32.mrf.mxu3 }
  0xbf   : > { %v432_v8 = vmul.f32 1.442695, %v1697_v26 }
  0xc0   : > { %v401_v29 = vpop.f32.mrf.mxu0 }
  0xc1   : > { %v424_v30 = vmul.f32 1.442695, %v401_v29  ;;  %v534_v31 = vpop.f32.mrf.mxu1  ;;  %v1314_v37 = vpop.eup %1313 }
  0xc2   : > { %v1145_v32 = vadd.f32 -1e+08, %v534_v31  ;;  %v1715_v45 = vsel %vm339_vm3, 0.0, %v1314_v37 }
  0xc3   : > { %1315 = vpow2.f32 %v424_v30 }
  0xc4   : > { %v1706_v35 = vsel %vm339_vm3, %v1145_v32, %v534_v31 }
  0xc5   : > { %578 = vmax.xlane.f32.xlu0 %v1706_v35  ;;  %v749_v30 = vmul.f32 %v1706_v35, %v1715_v45 }
  0xc6   : > { %v416_v36 = vpop.f32.mrf.mxu3 }
  0xc7   : > { %v544_v38 = vpop.f32.mrf.mxu2  ;;  %v434_v50 = vmul.f32 1.442695, %v416_v36 }
  0xc8   : > { %v404_v40 = vpop.f32.mrf.mxu0  ;;  %v1149_v41 = vadd.f32 -1e+08, %v544_v38 }
  0xc9   : > { %v1316_v43 = vpop.eup %1315  ;;  %v536_v44 = vpop.f32.mrf.mxu1  ;;  %v426_v52 = vmul.f32 1.442695, %v404_v40  ;;  %1317 = vpow2.f32 %v434_v50 }
  0xca   : > { %v1146_v46 = vadd.f32 -1e+08, %v536_v44  ;;  %v1720_v47 = vsel %vm343_vm4, %v1149_v41, %v544_v38  ;;  %v439_v48 = vsel %vm340_vm5, 0.0, %v1316_v43 }
  0xcb   : > { %586 = vmax.xlane.f32.xlu2 %v1720_v47  ;;  %v1178_v49 = vpack.c.bf16 %v439_v48, %v1715_v45  ;;  %1319 = vpow2.f32 %v426_v52  ;;  %v768_v11 = vadd.f32 %v439_v48, %v1715_v45 }
  0xcc   : > { %v1731_v53 = vsel %vm340_vm5, %v1146_v46, %v536_v44 }
  0xcd   : > { %580 = vmax.xlane.f32.xlu0 %v1731_v53  ;;  %1179 = vst [vmem:[%s1735_s14] sm:$0xff] %v1178_v49   ;;  %v750_v26 = vmul.f32 %v1731_v53, %v439_v48 }
  0xce   : > { %v419_v57 = vpop.f32.mrf.mxu3 }
  0xcf   : > { %v546_v58 = vpop.f32.mrf.mxu2  ;;  %v436_v59 = vmul.f32 1.442695, %v419_v57  ;;  %v1318_v7 = vpop.eup %1317  ;;  %v757_v34 = vadd.f32 %v750_v26, %v749_v30  ;;  %v1855_v26 = vld [vmem:[#allocation2 + $0x18] sm:$0xff] }
  0xd0   : > { %v407_v61 = vpop.f32.mrf.mxu0  ;;  %v1150_v62 = vadd.f32 -1e+08, %v546_v58  ;;  %v444_v15 = vsel %vm345_vm8, 0.0, %v1318_v7 }
  0xd1   : > { %v428_v63 = vmul.f32 1.442695, %v407_v61  ;;  %v539_v0 = vpop.f32.mrf.mxu1  ;;  %1321 = vpow2.f32 %v436_v59  ;;  %v1320_v9 = vpop.eup %1319  ;;  %v748_v59 = vld [vmem:[%s747_s17] sm:$0xff] }
  0xd2   : > { %v1147_v3 = vadd.f32 -1e+08, %v539_v0  ;;  %v1746_v4 = vsel %vm344_vm6, %v1150_v62, %v546_v58  ;;  %v440_v21 = vsel %vm341_vm7, 0.0, %v1320_v9 }
  0xd3   : > { %1323 = vpow2.f32 %v428_v63  ;;  %588 = vmax.xlane.f32.xlu2 %v1746_v4  ;;  %v769_v27 = vadd.f32 %v768_v11, %v440_v21  ;;  %v1518_v63 = vmov 0  }
  0xd4   : > { %v1752_v6 = vsel %vm341_vm7, %v1147_v3, %v539_v0  ;;  %1325 = vpow2.f32 %v432_v8  ;;  %1310 = vset.pattern.permute.xlu2 %v1518_v63  ;;  %1311 = vset.pattern.permute.xlu0 %v1518_v63  ;;  %v1804_v0 = vld [vmem:[#allocation2] sm:$0xff]  ;;  %v1816_v8 = vld [vmem:[#allocation2 + $0x8] sm:$0xff] }
  0xd5   : > { %582 = vmax.xlane.f32.xlu1 %v1752_v6  ;;  %v751_v31 = vmul.f32 %v1752_v6, %v440_v21 }
  0xd6   : > { %1312 = vset.pattern.permute.xlu1 %v1518_v63 }
  0xd7   : > { %v1322_v10 = vpop.eup %1321  ;;  %v549_v12 = vpop.f32.mrf.mxu2  ;;  %v758_v41 = vadd.f32 %v757_v34, %v751_v31  ;;  %v1873_v34 = vld [vmem:[#allocation2 + $0x38] sm:$0xff] }
  0xd8   : > { %v410_v13 = vpop.f32.mrf.mxu0  ;;  %v1151_v14 = vadd.f32 -1e+08, %v549_v12  ;;  %v445_v16 = vsel %vm346_vm9, 0.0, %v1322_v10 }
  0xd9   : > { %v1324_v17 = vpop.eup %1323  ;;  %v430_v18 = vmul.f32 1.442695, %v410_v13  ;;  %v541_v19 = vpop.f32.mrf.mxu1  ;;  %v1193_v20 = vpack.c.bf16 %v445_v16, %v444_v15 }
  0xda   : > { %v1148_v22 = vadd.f32 -1e+08, %v541_v19  ;;  %v1768_v23 = vsel %vm345_vm8, %v1151_v14, %v549_v12  ;;  %v441_v24 = vsel %vm342_vm10, 0.0, %v1324_v17  ;;  %v1326_v32 = vpop.eup %1325  ;;  %v1834_v14 = vld [vmem:[#allocation2 + $0x28] sm:$0xff] }
  0xdb   : > { %1327 = vpow2.f32 %v430_v18  ;;  %590 = vmax.xlane.f32.xlu0 %v1768_v23  ;;  %v1183_v28 = vpack.c.bf16 %v441_v24, %v440_v21  ;;  %1213 = vst [vmem:[%s1735_s14 + $0x18] sm:$0xff] %v1193_v20   ;;  %v770_v37 = vadd.f32 %v769_v27, %v441_v24  ;;  %v443_v42 = vsel %vm344_vm6, 0.0, %v1326_v32 }
  0xdc   : > { %v1777_v29 = vsel %vm342_vm10, %v1148_v22, %v541_v19  ;;  %v754_v50 = vmul.f32 %v1746_v4, %v443_v42  ;;  %v755_v33 = vmul.f32 %v1768_v23, %v444_v15  ;;  %v1853_v22 = vld [vmem:[#allocation2 + $0x30] sm:$0xff] }
  0xdd   : > { %584 = vmax.xlane.f32.xlu1 %v1777_v29  ;;  %1211 = vst [vmem:[%s1735_s14 + $0x8] sm:$0xff] %v1183_v28   ;;  %v752_v36 = vmul.f32 %v1777_v29, %v441_v24 }
  0xdf   : > { %v551_v38 = vpop.f32.mrf.mxu2  ;;  %v759_v46 = vadd.f32 %v758_v41, %v752_v36 }
  0xe0   : > { %v1152_v39 = vadd.f32 -1e+08, %v551_v38 }
  0xe1   : > { %v1328_v40 = vpop.eup %1327 }
  0xe2   : > { %v442_v43 = vsel %vm343_vm4, 0.0, %v1328_v40  ;;  %v1795_v49 = vsel %vm346_vm9, %v1152_v39, %v551_v38 }
  0xe3   : > { %v1188_v44 = vpack.c.bf16 %v443_v42, %v442_v43  ;;  %v753_v45 = vmul.f32 %v1720_v47, %v442_v43  ;;  %v771_v48 = vadd.f32 %v770_v37, %v442_v43  ;;  %v756_v57 = vmul.f32 %v1795_v49, %v445_v16 }
  0xe5   : > { %1212 = vst [vmem:[%s1735_s14 + $0x10] sm:$0xff] %v1188_v44   ;;  %v760_v51 = vadd.f32 %v759_v46, %v753_v45  ;;  %592 = vmax.xlane.f32.xlu1 %v1795_v49  ;;  %v772_v52 = vadd.f32 %v771_v48, %v443_v42 }
  0xe7   : > { %v761_v54 = vadd.f32 %v760_v51, %v754_v50  ;;  %v773_v55 = vadd.f32 %v772_v52, %v444_v15 }
  0xe9   : > { %v762_v58 = vadd.f32 %v761_v54, %v755_v33  ;;  %v774_v25 = vadd.f32 %v773_v55, %v445_v16  ;;  %v1836_v16 = vld [vmem:[#allocation2 + $0x10] sm:$0xff] }
  0xeb   : > { %v763_v60 = vadd.f32 %v762_v58, %v756_v57  ;;  %v775_v61 = vadd.f32 %v774_v25, %v767_v56 }
  0xed   : > { %v764_v62 = vadd.f32 %v763_v60, %v748_v59  ;;  %776 = vst [vmem:[%s766_s16] sm:$0xff] %v775_v61 }
  0xef   : > { %765 = vst [vmem:[%s747_s17] sm:$0xff] %v764_v62 }
 0x138   : > { %v579_v1 = vpop.xlane.xlu0 %578 }
 0x139   : > { %v1807_v2 = vmax.f32 %v1804_v0, %v579_v1 }
 0x13b   : > { %v610_v3 = vsub.f32 %v1804_v0, %v1807_v2  ;;  %739 = vst.msk [vmem:[#allocation2] sm:$0xff] %vm730_vm11, %v1807_v2  ;;  %644 = vperm.xlu2 %1310, %v1807_v2  }
 0x13e   : > { %v587_v7 = vpop.xlane.xlu2 %586 }
 0x13f   : > { %v1819_v9 = vmax.f32 %v1814_v5, %v587_v7 }
 0x140   : > { %v581_v10 = vpop.xlane.xlu0 %580 }
 0x141   : > { %v614_v11 = vsub.f32 %v1814_v5, %v1819_v9  ;;  %743 = vst.msk [vmem:[#allocation2 + $0x20] sm:$0xff] %vm730_vm11, %v1819_v9  ;;  %v1826_v12 = vmax.f32 %v1816_v8, %v581_v10  ;;  %v603_v5 = vld [vmem:[#allocation3 + $0x8] sm:$0xff] }
 0x143   : > { %v611_v13 = vsub.f32 %v1816_v8, %v1826_v12  ;;  %740 = vst.msk [vmem:[#allocation2 + $0x8] sm:$0xff] %vm730_vm11, %v1826_v12  ;;  %664 = vperm.xlu2 %1310, %v1819_v9   ;;  %649 = vperm.xlu0 %1311, %v1826_v12   ;;  %v626_v10 = vmul.f32 1.442695, %v614_v11 }
 0x145   : > { %v620_v0 = vmul.f32 1.442695, %v611_v13  ;;  %v605_v13 = vld [vmem:[#allocation3 + $0x18] sm:$0xff] }
 0x146   : > { %v589_v15 = vpop.xlane.xlu2 %588 }
 0x147   : > { %v1839_v17 = vmax.f32 %v1834_v14, %v589_v15  ;;  %v602_v15 = vld [vmem:[#allocation3] sm:$0xff] }
 0x148   : > { %v583_v18 = vpop.xlane.xlu1 %582 }
 0x149   : > { %v615_v19 = vsub.f32 %v1834_v14, %v1839_v17  ;;  %744 = vst.msk [vmem:[#allocation2 + $0x28] sm:$0xff] %vm730_vm11, %v1839_v17  ;;  %v1846_v20 = vmax.f32 %v1836_v16, %v583_v18  ;;  %669 = vperm.xlu1 %1312, %v1839_v17  }
 0x14b   : > { %v612_v21 = vsub.f32 %v1836_v16, %v1846_v20  ;;  %741 = vst.msk [vmem:[#allocation2 + $0x10] sm:$0xff] %vm730_vm11, %v1846_v20 }
 0x14d   : > { %v622_v9 = vmul.f32 1.442695, %v612_v21 }
 0x14e   : > { %v591_v24 = vpop.xlane.xlu0 %590 }
 0x14f   : > { %v1858_v27 = vmax.f32 %v1853_v22, %v591_v24 }
 0x150   : > { %v585_v28 = vpop.xlane.xlu1 %584 }
 0x151   : > { %v616_v30 = vsub.f32 %v1853_v22, %v1858_v27  ;;  %745 = vst.msk [vmem:[#allocation2 + $0x30] sm:$0xff] %vm730_vm11, %v1858_v27  ;;  %v1865_v31 = vmax.f32 %v1855_v26, %v585_v28  ;;  %654 = vperm.xlu1 %1312, %v1846_v20   ;;  %v604_v22 = vld [vmem:[#allocation3 + $0x10] sm:$0xff] }
 0x153   : > { %v613_v32 = vsub.f32 %v1855_v26, %v1865_v31  ;;  %742 = vst.msk [vmem:[#allocation2 + $0x18] sm:$0xff] %vm730_vm11, %v1865_v31  ;;  %659 = vperm.xlu2 %1310, %v1865_v31   ;;  %v630_v8 = vmul.f32 1.442695, %v616_v30  ;;  %v628_v26 = vmul.f32 1.442695, %v615_v19 }
 0x155   : > { %v624_v2 = vmul.f32 1.442695, %v613_v32 }
 0x158   : > { %v593_v36 = vpop.xlane.xlu1 %592 }
 0x159   : > { %v1876_v37 = vmax.f32 %v1873_v34, %v593_v36 }
 0x15b   : > { %v617_v38 = vsub.f32 %v1873_v34, %v1876_v37  ;;  %746 = vst.msk [vmem:[#allocation2 + $0x38] sm:$0xff] %vm730_vm11, %v1876_v37  ;;  %679 = vperm.xlu1 %1312, %v1876_v37   ;;  %674 = vperm.xlu2 %1310, %v1858_v27   ;;  %v609_v37 = vld [vmem:[#allocation3 + $0x38] sm:$0xff] }
 0x15d   : > { %v632_v21 = vmul.f32 1.442695, %v617_v38 }
 0x195   : > { %v645_v39 = vpop.permute.xlu2 %644 }
 0x196   : > { %v682_v40 = vsub.f32 %v1706_v35, %v645_v39  ;;  %v606_v39 = vld [vmem:[#allocation3 + $0x20] sm:$0xff] }
 0x198   : > { %v690_v41 = vmul.f32 1.442695, %v682_v40 }
 0x19a   : > { %1329 = vpow2.f32 %v690_v41 }
 0x19d   : > { %v665_v42 = vpop.permute.xlu2 %664 }
 0x19e   : > { %v686_v43 = vsub.f32 %v1720_v47, %v665_v42 }
 0x1a0   : > { %v1330_v44 = vpop.eup %1329  ;;  %v698_v45 = vmul.f32 1.442695, %v686_v43 }
 0x1a1   : > { %706 = vadd.xlane.f32.xlu0 %v1330_v44 }
 0x1a2   : > { %1331 = vpow2.f32 %v698_v45  ;;  %v608_v45 = vld [vmem:[#allocation3 + $0x30] sm:$0xff] }
 0x1a8   : > { %v1332_v46 = vpop.eup %1331 }
 0x1a9   : > { %714 = vadd.xlane.f32.xlu0 %v1332_v46 }
 0x1ad   : > { %v660_v50 = vpop.permute.xlu2 %659 }
 0x1ae   : > { %v685_v33 = vsub.f32 %v1777_v29, %v660_v50 }
 0x1b0   : > { %v696_v54 = vmul.f32 1.442695, %v685_v33 }
 0x1b5   : > { %v650_v48 = vpop.permute.xlu0 %649  ;;  %v675_v55 = vpop.permute.xlu2 %674 }
 0x1b6   : > { %v683_v51 = vsub.f32 %v1731_v53, %v650_v48  ;;  %v688_v47 = vsub.f32 %v1768_v23, %v675_v55 }
 0x1b8   : > { %v692_v52 = vmul.f32 1.442695, %v683_v51  ;;  %v702_v59 = vmul.f32 1.442695, %v688_v47  ;;  %v607_v51 = vld [vmem:[#allocation3 + $0x28] sm:$0xff] }
 0x1ba   : > { %1333 = vpow2.f32 %v692_v52 }
 0x1bb   : > { %v670_v35 = vpop.permute.xlu1 %669  ;;  %1335 = vpow2.f32 %v696_v54 }
 0x1bc   : > { %v687_v60 = vsub.f32 %v1746_v4, %v670_v35  ;;  %v618_v4 = vmul.f32 1.442695, %v610_v3 }
 0x1be   : > { %v700_v29 = vmul.f32 1.442695, %v687_v60 }
 0x1c0   : > { %v1334_v56 = vpop.eup %1333 }
 0x1c1   : > { %708 = vadd.xlane.f32.xlu2 %v1334_v56  ;;  %v1336_v53 = vpop.eup %1335 }
 0x1c3   : > { %v655_v57 = vpop.permute.xlu1 %654 }
 0x1c4   : > { %v684_v58 = vsub.f32 %v1752_v6, %v655_v57 }
 0x1c6   : > { %v694_v25 = vmul.f32 1.442695, %v684_v58 }
 0x1c8   : > { %1337 = vpow2.f32 %v694_v25 }
 0x1c9   : > { %712 = vadd.xlane.f32.xlu2 %v1336_v53  ;;  %1339 = vpow2.f32 %v702_v59 }
 0x1ca   : > { %1341 = vpow2.f32 %v700_v29 }
 0x1cd   : > { %v680_v61 = vpop.permute.xlu1 %679 }
 0x1ce   : > { %v1338_v62 = vpop.eup %1337  ;;  %v689_v63 = vsub.f32 %v1795_v49, %v680_v61 }
 0x1cf   : > { %710 = vadd.xlane.f32.xlu1 %v1338_v62  ;;  %v1340_v23 = vpop.eup %1339 }
 0x1d0   : > { %v704_v1 = vmul.f32 1.442695, %v689_v63  ;;  %v1342_v6 = vpop.eup %1341 }
 0x1d1   : > { %718 = vadd.xlane.f32.xlu2 %v1340_v23 }
 0x1d2   : > { %1343 = vpow2.f32 %v704_v1 }
 0x1d3   : > { %1345 = vpow2.f32 %v618_v4 }
 0x1d4   : > { %1347 = vpow2.f32 %v626_v10 }
 0x1d5   : > { %1349 = vpow2.f32 %v620_v0 }
 0x1d6   : > { %1351 = vpow2.f32 %v624_v2 }
 0x1d7   : > { %716 = vadd.xlane.f32.xlu1 %v1342_v6  ;;  %1353 = vpow2.f32 %v622_v9 }
 0x1d8   : > { %v1344_v7 = vpop.eup %1343  ;;  %1355 = vpow2.f32 %v630_v8 }
 0x1d9   : > { %720 = vadd.xlane.f32.xlu0 %v1344_v7  ;;  %v1346_v49 = vpop.eup %1345  ;;  %1357 = vpow2.f32 %v628_v26 }
 0x1da   : > { %v634_v18 = vmul.f32 %v1346_v49, %v602_v15  ;;  %v1348_v36 = vpop.eup %1347  ;;  %1359 = vpow2.f32 %v632_v21 }
 0x1db   : > { %v638_v40 = vmul.f32 %v1348_v36, %v606_v39  ;;  %v1350_v3 = vpop.eup %1349 }
 0x1dc   : > { %v635_v11 = vmul.f32 %v1350_v3, %v603_v5  ;;  %v1352_v12 = vpop.eup %1351 }
 0x1dd   : > { %v637_v31 = vmul.f32 %v1352_v12, %v605_v13  ;;  %v1354_v20 = vpop.eup %1353 }
 0x1de   : > { %v1356_v27 = vpop.eup %1355  ;;  %v636_v30 = vmul.f32 %v1354_v20, %v604_v22 }
 0x1df   : > { %v640_v14 = vmul.f32 %v1356_v27, %v608_v45  ;;  %v1358_v19 = vpop.eup %1357 }
 0x1e0   : > { %v1360_v34 = vpop.eup %1359  ;;  %v639_v38 = vmul.f32 %v1358_v19, %v607_v51 }
 0x1e1   : > { %v641_v35 = vmul.f32 %v1360_v34, %v609_v37 }
 0x214   : > { %v707_v24 = vpop.xlane.xlu0 %706 }
 0x215   : > { %v722_v28 = vadd.f32 %v707_v24, %v634_v18 }
 0x217   : > { %731 = vst.msk [vmem:[#allocation3] sm:$0xff] %vm730_vm11, %v722_v28 }
 0x21c   : > { %v715_v41 = vpop.xlane.xlu0 %714 }
 0x21d   : > { %v726_v42 = vadd.f32 %v715_v41, %v638_v40 }
 0x21f   : > { %735 = vst.msk [vmem:[#allocation3 + $0x20] sm:$0xff] %vm730_vm11, %v726_v42 }
 0x234   : > { %v709_v43 = vpop.xlane.xlu2 %708 }
 0x235   : > { %v723_v44 = vadd.f32 %v709_v43, %v635_v11 }
 0x237   : > { %732 = vst.msk [vmem:[#allocation3 + $0x8] sm:$0xff] %vm730_vm11, %v723_v44 }
 0x23c   : > { %v713_v16 = vpop.xlane.xlu2 %712 }
 0x23d   : > { %v725_v32 = vadd.f32 %v713_v16, %v637_v31 }
 0x23f   : > { %734 = vst.msk [vmem:[#allocation3 + $0x18] sm:$0xff] %vm730_vm11, %v725_v32 }
 0x242   : > { %v711_v46 = vpop.xlane.xlu1 %710 }
 0x243   : > { %v724_v48 = vadd.f32 %v711_v46, %v636_v30 }
 0x244   : > { %v719_v17 = vpop.xlane.xlu2 %718 }
 0x245   : > { %733 = vst.msk [vmem:[#allocation3 + $0x10] sm:$0xff] %vm730_vm11, %v724_v48  ;;  %v728_v50 = vadd.f32 %v719_v17, %v640_v14 }
 0x247   : > { %737 = vst.msk [vmem:[#allocation3 + $0x30] sm:$0xff] %vm730_vm11, %v728_v50 }
 0x24a   : > { %v717_v52 = vpop.xlane.xlu1 %716 }
 0x24b   : > { %v727_v33 = vadd.f32 %v717_v52, %v639_v38  ;;  %780 = sbr.rel (%p1153_p1) target bundleno = 754 (0x2f2), region = 44 }
 0x24c   : > { %v721_v54 = vpop.xlane.xlu0 %720 }
 0x24d   : > { %736 = vst.msk [vmem:[#allocation3 + $0x28] sm:$0xff] %vm730_vm11, %v727_v33  ;;  %v729_v55 = vadd.f32 %v721_v54, %v641_v35 }
 0x24f   : > { %738 = vst.msk [vmem:[#allocation3 + $0x38] sm:$0xff] %vm730_vm11, %v729_v55 }
 0x250   : > { %v789_v56 = vld [vmem:[#allocation3] sm:$0xff]  ;;  %v790_v47 = vld [vmem:[#allocation3 + $0x8] sm:$0xff]  ;;  %v791_v57 = vld [vmem:[#allocation3 + $0x10] sm:$0xff] }
 0x251   : > { %v792_v58 = vld [vmem:[#allocation3 + $0x18] sm:$0xff]  ;;  %1361 = vlog2.f32 %v789_v56  ;;  %v793_v25 = vld [vmem:[#allocation3 + $0x20] sm:$0xff]  ;;  %v795_v60 = vld [vmem:[#allocation3 + $0x30] sm:$0xff] }
 0x252   : > { %1363 = vlog2.f32 %v790_v47  ;;  %v781_v61 = vld [vmem:[#allocation2] sm:$0xff]  ;;  %v782_v63 = vld [vmem:[#allocation2 + $0x8] sm:$0xff]  ;;  %v783_v6 = vld [vmem:[#allocation2 + $0x10] sm:$0xff] }
 0x253   : > { %1365 = vlog2.f32 %v791_v57  ;;  %v784_v10 = vld [vmem:[#allocation2 + $0x18] sm:$0xff]  ;;  %v785_v24 = vld [vmem:[#allocation2 + $0x20] sm:$0xff]  ;;  %v786_v40 = vld [vmem:[#allocation2 + $0x28] sm:$0xff] }
 0x254   : > { %v794_v59 = vld [vmem:[#allocation3 + $0x28] sm:$0xff]  ;;  %1367 = vlog2.f32 %v792_v58  ;;  %v787_v2 = vld [vmem:[#allocation2 + $0x30] sm:$0xff]  ;;  %v788_v11 = vld [vmem:[#allocation2 + $0x38] sm:$0xff] }
 0x255   : > { %1369 = vlog2.f32 %v793_v25 }
 0x256   : > { %v796_v53 = vld [vmem:[#allocation3 + $0x38] sm:$0xff]  ;;  %1371 = vlog2.f32 %v794_v59 }
 0x257   : > { %v1362_v29 = vpop.eup %1361  ;;  %1373 = vlog2.f32 %v795_v60 }
 0x258   : > { %v1364_v62 = vpop.eup %1363  ;;  %v798_v1 = vmul.f32 0.6931472, %v1362_v29  ;;  %1375 = vlog2.f32 %v796_v53 }
 0x259   : > { %v1366_v23 = vpop.eup %1365  ;;  %v800_v7 = vmul.f32 0.6931472, %v1364_v62 }
 0x25a   : > { %v1368_v4 = vpop.eup %1367  ;;  %v802_v49 = vmul.f32 0.6931472, %v1366_v23  ;;  %v1925_v15 = vadd.f32 %v798_v1, %v781_v61 }
 0x25b   : > { %v1370_v18 = vpop.eup %1369  ;;  %v804_v28 = vmul.f32 0.6931472, %v1368_v4  ;;  %v1927_v36 = vadd.f32 %v800_v7, %v782_v63 }
 0x25c   : > { %v1372_v39 = vpop.eup %1371  ;;  %v806_v41 = vmul.f32 0.6931472, %v1370_v18  ;;  %v1929_v42 = vadd.f32 %v802_v49, %v783_v6 }
 0x25d   : > { %v1374_v0 = vpop.eup %1373  ;;  %v808_v3 = vmul.f32 0.6931472, %v1372_v39  ;;  %v1931_v5 = vadd.f32 %v804_v28, %v784_v10 }
 0x25e   : > { %v1376_v9 = vpop.eup %1375  ;;  %v810_v43 = vmul.f32 0.6931472, %v1374_v0  ;;  %v1933_v44 = vadd.f32 %v806_v41, %v785_v24 }
 0x25f   : > { %v812_v8 = vmul.f32 0.6931472, %v1376_v9  ;;  %v1935_v12 = vadd.f32 %v808_v3, %v786_v40 }
 0x260   : > { %v1937_v13 = vadd.f32 %v810_v43, %v787_v2 }
 0x261   : > { %v820_v26 = vadd.f32 %v812_v8, %v788_v11 }
 0x262 LB: >> { %v1519_v31 = vmov 0   ;;  %s1172_s26 = sshll.u32 %s1514_s21, 5  ;;  %s1154_s7 = sshll.u32 %s1514_s21, 3  ;;  %s1514_s21 = sphi %s1939_s21, %s826_s21  }
 0x263   : >> { %1378 = vset.pattern.permute.xlu1 %v1519_v31  ;;  %1377 = vset.pattern.permute.xlu0 %v1519_v31  ;;  %s829_s27 = scalar_lea.vmem [#allocation4], %s1172_s26  ;;  %s894_s8 = scalar_lea.vmem %s1641_s9, %s1154_s7 [#allocation5] }
 0x264   : >> { %858 = vperm.xlu1 %1378, %v1929_v42   ;;  %848 = vperm.xlu0 %1377, %v1925_v15   ;;  %v1196_v21 = vld [vmem:[%s829_s27] sm:$0xff]   ;;  %v1214_v22 = vld [vmem:[%s829_s27 + $0x8] sm:$0xff]   ;;  %v1215_v46 = vld [vmem:[%s829_s27 + $0x10] sm:$0xff]   ;;  %s826_s21 = sadd.s32 1, %s1514_s21  }
 0x265   : >> { %1379 = vset.pattern.permute.xlu2 %v1519_v31  ;;  %v1197_v27 = vunpack.c.l.bf16 %v1196_v21  ;;  %v1198_v30 = vunpack.c.h.bf16 %v1196_v21  ;;  %v1201_v45 = vunpack.c.l.bf16 %v1214_v22  ;;  %v1202_v19 = vunpack.c.h.bf16 %v1214_v22  ;;  %v1216_v38 = vld [vmem:[%s829_s27 + $0x18] sm:$0xff]   ;;  %v895_v63 = vld [vmem:[%s894_s8] sm:$0xff]  ;;  %p823_p2 = scmp.ge.s32.totalorder %s826_s21, 2  }
 0x266   : >> { %868 = vperm.xlu2 %1379, %v1933_v44   ;;  %v1205_v51 = vunpack.c.l.bf16 %v1215_v46  ;;  %v1206_v52 = vunpack.c.h.bf16 %v1215_v46  ;;  %v1209_v47 = vunpack.c.l.bf16 %v1216_v38  ;;  %v1210_v25 = vunpack.c.h.bf16 %v1216_v38 }
 0x26c   : >> { %863 = vperm.xlu1 %1378, %v1931_v5   ;;  %853 = vperm.xlu0 %1377, %v1927_v36  }
 0x26e   : >> { %873 = vperm.xlu2 %1379, %v1935_v12  }
 0x274   : >> { %883 = vperm.xlu1 %1378, %v820_v26   ;;  %878 = vperm.xlu0 %1377, %v1937_v13  }
 0x2c0   : >> { %v869_v32 = vpop.permute.xlu2 %868 }
 0x2c1   : >> { %v890_v55 = vmul.f32 %v1205_v51, %v869_v32 }
 0x2c8   : >> { %v874_v54 = vpop.permute.xlu2 %873 }
 0x2c9   : >> { %v891_v58 = vmul.f32 %v1206_v52, %v874_v54 }
 0x2d6   : >> { %v859_v16 = vpop.permute.xlu1 %858  ;;  %v849_v20 = vpop.permute.xlu0 %848 }
 0x2d7   : >> { %v886_v17 = vmul.f32 %v1197_v27, %v849_v20  ;;  %v888_v34 = vmul.f32 %v1201_v45, %v859_v16 }
 0x2de   : >> { %v864_v48 = vpop.permute.xlu1 %863  ;;  %v854_v14 = vpop.permute.xlu0 %853 }
 0x2df   : >> { %v887_v50 = vmul.f32 %v1198_v30, %v854_v14  ;;  %v889_v33 = vmul.f32 %v1202_v19, %v864_v48 }
 0x2e1   : >> { %v896_v37 = vadd.f32 %v887_v50, %v886_v17 }
 0x2e3   : >> { %v897_v35 = vadd.f32 %v896_v37, %v888_v34 }
 0x2e5   : >> { %v898_v56 = vadd.f32 %v897_v35, %v889_v33 }
 0x2e6   : >> { %v879_v57 = vpop.permute.xlu0 %878  ;;  %v884_v60 = vpop.permute.xlu1 %883 }
 0x2e7   : >> { %v899_v59 = vadd.f32 %v898_v56, %v890_v55  ;;  %v892_v53 = vmul.f32 %v1209_v47, %v879_v57  ;;  %v893_v61 = vmul.f32 %v1210_v25, %v884_v60 }
 0x2e9   : >> { %v900_v29 = vadd.f32 %v899_v59, %v891_v58 }
 0x2eb   : >> { %v901_v62 = vadd.f32 %v900_v29, %v892_v53 }
 0x2ed   : >> { %v902_v1 = vadd.f32 %v901_v62, %v893_v61  ;;  %825 = sbr.rel (!%p823_p2) target bundleno = 610 (0x262), region = 115 }
 0x2ef   : >> { %v903_v23 = vsub.f32 %v895_v63, %v902_v1 }
 0x2f1   : >> { %904 = vst [vmem:[%s894_s8] sm:$0xff] %v903_v23 }
 0x2f2 PF: > { %s1173_s24 = sshll.u32 %s1498_s22, 4  ;;  %s923_s23 = sshll.u32 %s1641_s9, 4  ;;  %s924_s23 = int_to_ptr.vmem [resolvable:$true] %s923_s23 }
 0x2f3   : > { %s922_s11 = scalar_lea.hbm %s2020_s4, %s1173_s24  ;;  %s906_s13 = scalar_lea.sflag [#allocation6], %s1622_s10 }
 0x2f4   : > { %s925_s12 = sshll.u32 %s922_s11, 4  ;;  %s1400_s22 = scalar_lea.hbm %s2020_s4, 64  ;;  %s926_s12 = int_to_ptr.hbm [resolvable:$true] %s925_s12 }
 0x2f5   : > { %s1394_s14 = sshra.s32 %s926_s12, 4  ;;  %s1395_s14 = int_to_ptr.hbm [resolvable:$true] %s1394_s14 }
 0x2f6   : > { %s1396_s15 = scalar_lea.hbm %s1395_s14, 16  ;;  %p1401_p7 = scmp.lt.s32.totalorder %s1395_s14, %s2020_s4 }
 0x2f7   : > { %p1397_p4 = scmp.ne.s32.totalorder %s1395_s14, %s1396_s15  ;;  %p1402_p8 = scmp.lt.s32.totalorder %s1400_s22, %s1396_s15 }
 0x2f9   : > { %p1398_p5 = pnand %p1397_p4, %p1601_p3  ;;  %p1403_p10 = por %p1402_p8, %p1401_p7 }
 0x2fb   : > { %p1399_p6 = pneg %p1398_p5 }
 0x2fd   : > { %p1404_p11 = pnand %p1403_p10, %p1399_p6 }
 0x2ff   : > { %1407 = shalt.err (!%p1404_p11)
}
 0x300   : > { %s1520_s9 = smov 128   ;;  %s1521_s27 = smov 8  }
 0x301   : > { %1220 = dma.vmem_to_hbm [thread:$0]  (%p1601_p3), %s924_s23, 256, %s926_s12, %s906_s13, %s1520_s9, %s1520_s9, %s1521_s27  }
 0x302   : > { %s939_s28 = scalar_lea.hbm %s2021_s5, %s1173_s24  ;;  %s940_s29 = sshll.u32 %s1643_s20, 4  ;;  %s941_s29 = int_to_ptr.vmem [resolvable:$true] %s940_s29 }
 0x303   : > { %s942_s11 = sshll.u32 %s939_s28, 4  ;;  %s911_s14 = scalar_lea.sflag [#allocation8], %s1622_s10  ;;  %s943_s11 = int_to_ptr.hbm [resolvable:$true] %s942_s11 }
 0x304   : > { %s1422_s15 = sshra.s32 %s943_s11, 4  ;;  %s1428_s23 = scalar_lea.hbm %s2021_s5, 64  ;;  %s1423_s15 = int_to_ptr.hbm [resolvable:$true] %s1422_s15 }
 0x305   : > { %s1424_s16 = scalar_lea.hbm %s1423_s15, 16  ;;  %p1429_p1 = scmp.lt.s32.totalorder %s1423_s15, %s2021_s5 }
 0x306   : > { %p1425_p12 = scmp.ne.s32.totalorder %s1423_s15, %s1424_s16  ;;  %p1430_p2 = scmp.lt.s32.totalorder %s1428_s23, %s1424_s16 }
 0x308   : > { %p1426_p13 = pnand %p1425_p12, %p1601_p3  ;;  %p1431_p4 = por %p1430_p2, %p1429_p1 }
 0x30a   : > { %p1427_p0 = pneg %p1426_p13 }
 0x30c   : > { %p1432_p5 = pnand %p1431_p4, %p1427_p0 }
 0x30e   : > { %1435 = shalt.err (!%p1432_p5)
}
 0x30f   : > { %1221 = dma.vmem_to_hbm [thread:$0]  (%p1601_p3), %s941_s29, 256, %s943_s11, %s911_s14, %s1520_s9, %s1520_s9, %s1521_s27  }
 0x310 PF: > { %p1231_p6 = scmp.ge.s32.totalorder %s1510_s25, 2  ;;  %s957_s20 = sand.u32 1, %s1482_s18  }
 0x311   : > { %s958_s10 = scalar_lea.sflag [#allocation6], %s957_s20 }
 0x312   : > { %p1225_p7 = pnand %p1231_p6, %p1611_p9 }
 0x314   : > { %p1226_p8 = pneg %p1225_p7 }
 0x316   : > { %1473 = dma.done.wait (%p1226_p8), %s958_s10, 256  }
 0x317   : > { %1475 = vsyncadd (%p1226_p8), %s958_s10, 4294967040  ;;  %s968_s24 = scalar_lea.sflag [#allocation8], %s957_s20 }
 0x318   : > { %1477 = dma.done.wait (%p1226_p8), %s968_s24, 256  }
 0x319   : > { %1479 = vsyncadd (%p1226_p8), %s968_s24, 4294967040  ;;  %s22_s25 = sadd.s32 1, %s1510_s25   ;;  %s2034_s30 = sld [smem:[#allocation11_spill]] }
 0x31a   : > { %p19_p10 = scmp.ge.s32.totalorder %s22_s25, 10   ;;  %s2035_s20 = sld [smem:[#allocation16_spill]] }
 0x31b   : > { %s2036_s21 = sld [smem:[#allocation12_spill]]  ;;  %s2040_s18 = smov %s1486_s19 }
 0x31c   : > { %s2037_s22 = sld [smem:[#allocation13_spill]]  ;;  %21 = sbr.rel (!%p19_p10) target bundleno = 7 (0x7), region = 126 }
 0x31d   : > { %s2038_s23 = sld [smem:[#allocation14_spill]] }
 0x31e   : > { %s2039_s24 = sld [smem:[#allocation15_spill]] }
 0x31f   : > { %s2041_s19 = smov %s2034_s30 }
 0x321   :  { %974 = vsyncpa [#allocation6], 1 }
 0x322   :  { %976 = vsyncpa [#allocation6 + $0x1], 1 }
 0x323   :  { %977 = vsyncpa [#allocation8], 1 }
 0x324   :  { %979 = vsyncpa [#allocation8 + $0x1], 1 }

</bundles_post_ra>
